<compile_context>
chip_gen: v5e
topology: v5e:2x2
jax: 0.10.0
libtpu: 0.0.40
codegen_flags: <defaults>
</compile_context>

<pallas_src>
import jax
import jax.numpy as jnp
from jax.experimental import pallas as pl
from jax.experimental.pallas import tpu as pltpu


# SALN hidden dims (<= 512) always take the single-K-block path.
_K_SINGLE_BLOCK_MAX = 1024
_TK_SPLIT = 512
_TM_MAX = 512
_TN_MAX = 512


def _round_up(x, m):
    return (x + m - 1) // m * m


def _pick_tm(M):
    """Row-tile size: full extent for tiny M; otherwise prefer >= 2 M-blocks
    (so both v7x TensorCores get work on the 'parallel' axis), capped at 512."""
    if M <= 256:
        return M  # full-extent block is always layout-legal
    for cand in (_TM_MAX, 256, 128):
        if pl.cdiv(M, cand) >= 2:
            return cand
    return 128


def _pick_tn(N):
    return N if N <= _TN_MAX else _TN_MAX


def _affine_linear_kernel(x_ref, w_ref, b_ref, o_ref):
    """Single-K-block path: one (tm, tn) output tile, K fully resident.

    x_ref: (tm, K)   w_ref: (K, tn)   b_ref: (1, tn)   o_ref: (tm, tn)
    """
    acc = jnp.dot(
        x_ref[...].astype(w_ref.dtype),  # no-op for f32; bf16 cast is VPU work
        w_ref[...],
        preferred_element_type=jnp.float32,
    )
    o_ref[...] = (acc + b_ref[...].astype(jnp.float32)).astype(o_ref.dtype)


def _affine_linear_kernel_ksplit(x_ref, w_ref, b_ref, o_ref, acc_ref):
    """Large-K path: accumulate over the K grid axis into an f32 VMEM scratch.

    x_ref: (tm, tk)  w_ref: (tk, tn)  b_ref: (1, tn)  o_ref/acc_ref: (tm, tn)
    """
    k = pl.program_id(2)

    @pl.when(k == 0)
    def _():
        acc_ref[...] = jnp.zeros_like(acc_ref)

    acc_ref[...] += jnp.dot(
        x_ref[...].astype(w_ref.dtype),
        w_ref[...],
        preferred_element_type=jnp.float32,
    )

    @pl.when(k == pl.num_programs(2) - 1)
    def _():
        o_ref[...] = (acc_ref[...] + b_ref[...].astype(jnp.float32)).astype(o_ref.dtype)


def prepare_affine_params(weight, bias, *, compute_dtype=None):
    """One-time parameter prep (hoist outside the per-step hot path).

    weight: (out_channels, in_channels)  -- PyTorch nn.Linear layout
    bias:   (out_channels,)
    Returns (w_t, b_row):
      w_t:   (K or Kp, N)  K-major weight (optionally cast, K-padded only if
                           the reduction will be split across grid steps)
      b_row: (1, N)        f32 bias row
    """
    K = weight.shape[1]
    w_t = jnp.transpose(weight)  # (K, N): MXU-friendly, no per-tile transpose
    if compute_dtype is not None:
        w_t = w_t.astype(compute_dtype)
    if K > _K_SINGLE_BLOCK_MAX:
        Kp = _round_up(K, _TK_SPLIT)
        if Kp != K:
            w_t = jnp.pad(w_t, ((0, Kp - K), (0, 0)))
    b_row = jnp.reshape(bias, (1, -1)).astype(jnp.float32)
    return w_t, b_row


def affine_linear(x, w_t, b_row):
    """out[..., n] = sum_k x[..., k] * w_t[k, n] + b_row[0, n]

    x:     (..., K)        activations (any float dtype; output keeps x.dtype)
    w_t:   (K or Kp, N)    from prepare_affine_params
    b_row: (1, N)          from prepare_affine_params
    """
    *lead, K = x.shape
    Kp, N = w_t.shape
    assert Kp >= K
    out_dtype = x.dtype

    x2 = x.reshape(-1, K)
    M = x2.shape[0]

    tm = _pick_tm(M)
    tn = _pick_tn(N)
    grid_m = pl.cdiv(M, tm)
    grid_n = pl.cdiv(N, tn)

    split_k = Kp > _K_SINGLE_BLOCK_MAX
    if split_k and Kp != K:
        # Zero-pad x along K only when the reduction is split across grid
        # steps (never hit for SALN-sized hidden dims).
        x2 = jnp.pad(x2, ((0, 0), (0, Kp - K)))

    # Advisory cost estimate reflecting the real streamed traffic:
    # x re-read grid_n times, W re-read grid_m times, output written once.
    cost = pl.CostEstimate(
        flops=2 * M * K * N,
        transcendentals=0,
        bytes_accessed=int(
            grid_n * M * Kp * x2.dtype.itemsize
            + grid_m * Kp * N * w_t.dtype.itemsize
            + grid_m * N * b_row.dtype.itemsize
            + M * N * jnp.dtype(out_dtype).itemsize
        ),
    )

    if not split_k:
        out = pl.pallas_call(
            _affine_linear_kernel,
            out_shape=jax.ShapeDtypeStruct((M, N), out_dtype),
            grid_spec=pltpu.PrefetchScalarGridSpec(
                num_scalar_prefetch=0,
                grid=(grid_m, grid_n),
                in_specs=[
                    pl.BlockSpec((tm, Kp), lambda i, j: (i, 0)),
                    pl.BlockSpec((Kp, tn), lambda i, j: (0, j)),
                    pl.BlockSpec((1, tn), lambda i, j: (0, j)),
                ],
                out_specs=pl.BlockSpec((tm, tn), lambda i, j: (i, j)),
            ),
            compiler_params=pltpu.CompilerParams(
                dimension_semantics=("parallel", "parallel"),
                vmem_limit_bytes=32 * 1024 * 1024,  # safe on v5e 16 MiB default
            ),
            cost_estimate=cost,
        )(x2, w_t, b_row)
    else:
        tk = _TK_SPLIT
        grid_k = Kp // tk
        out = pl.pallas_call(
            _affine_linear_kernel_ksplit,
            out_shape=jax.ShapeDtypeStruct((M, N), out_dtype),
            grid_spec=pltpu.PrefetchScalarGridSpec(
                num_scalar_prefetch=0,
                grid=(grid_m, grid_n, grid_k),
                in_specs=[
                    pl.BlockSpec((tm, tk), lambda i, j, k: (i, k)),
                    pl.BlockSpec((tk, tn), lambda i, j, k: (k, j)),
                    pl.BlockSpec((1, tn), lambda i, j, k: (0, j)),
                ],
                # Same output block for every k -> VMEM-resident accumulator.
                out_specs=pl.BlockSpec((tm, tn), lambda i, j, k: (i, j)),
                scratch_shapes=[pltpu.VMEM((tm, tn), jnp.float32)],
            ),
            compiler_params=pltpu.CompilerParams(
                dimension_semantics=("parallel", "parallel", "arbitrary"),
                vmem_limit_bytes=32 * 1024 * 1024,
            ),
            cost_estimate=cost,
        )(x2, w_t, b_row)

    return out.reshape(*lead, N)


if __name__ == "__main__":
    key = jax.random.PRNGKey(0)
    ks = jax.random.split(key, 12)

    def make_params(kw, kb, in_ch, out_ch):
        # Mimic nn.Linear's U(-1/sqrt(in), 1/sqrt(in)) init.
        bound = 1.0 / jnp.sqrt(jnp.float32(in_ch))
        w = jax.random.uniform(kw, (out_ch, in_ch), jnp.float32, -bound, bound)
        b = jax.random.uniform(kb, (out_ch,), jnp.float32, -bound, bound)
        return w, b

    # --- Test 1: small aligned case (batch=2, seq=8, hidden=32) ------------
    B, T, IN, OUT = 2, 8, 32, 32
    w1, b1 = make_params(ks[0], ks[1], IN, OUT)
    x1 = jax.random.normal(ks[2], (B, T, IN), jnp.float32)
    wt1, br1 = prepare_affine_params(w1, b1)
    out1 = jax.block_until_ready(affine_linear(x1, wt1, br1))
    ref1 = x1 @ w1.T + b1
    assert out1.shape == (B, T, OUT)
    assert jnp.allclose(out1, ref1, atol=1e-4, rtol=1e-5)

    # --- Test 2: ragged M, unaligned channels (no padding anywhere) --------
    B2, T2, IN2, OUT2 = 3, 37, 80, 192
    w2, b2 = make_params(ks[3], ks[4], IN2, OUT2)
    x2 = jax.random.normal(ks[5], (B2, T2, IN2), jnp.float32)
    wt2, br2 = prepare_affine_params(w2, b2)
    out2 = jax.block_until_ready(affine_linear(x2, wt2, br2))
    ref2 = x2 @ w2.T + b2
    assert out2.shape == (B2, T2, OUT2)
    assert jnp.allclose(out2, ref2, atol=1e-4, rtol=1e-5)

    # --- Test 3: bf16 operands / f32 accumulation (perf-mode path) ---------
    wt2_bf16, br2_bf16 = prepare_affine_params(w2, b2, compute_dtype=jnp.bfloat16)
    out2_bf16 = jax.block_until_ready(affine_linear(x2, wt2_bf16, br2_bf16))
    assert out2_bf16.shape == (B2, T2, OUT2)
    assert jnp.allclose(out2_bf16, ref2, atol=3e-2, rtol=3e-2)

    # --- Test 4: SALN-like shapes, multiple M blocks (megacore path) -------
    B3, T3, IN3, OUT3 = 4, 275, 256, 384
    w3, b3 = make_params(ks[6], ks[7], IN3, OUT3)
    x3 = jax.random.normal(ks[8], (B3, T3, IN3), jnp.float32)
    wt3, br3 = prepare_affine_params(w3, b3)
    out3 = jax.block_until_ready(affine_linear(x3, wt3, br3))
    ref3 = x3 @ w3.T + b3
    assert out3.shape == (B3, T3, OUT3)
    assert jnp.allclose(out3, ref3, atol=2e-3, rtol=2e-3)

    # --- Test 5: large-K fallback (K split across grid, f32 accumulator) ---
    B4, T4, IN4, OUT4 = 1, 64, 1600, 256
    w4, b4 = make_params(ks[9], ks[10], IN4, OUT4)
    x4 = jax.random.normal(ks[11], (B4, T4, IN4), jnp.float32)
    wt4, br4 = prepare_affine_params(w4, b4)
    out4 = jax.block_until_ready(affine_linear(x4, wt4, br4))
    ref4 = x4 @ w4.T + b4
    assert out4.shape == (B4, T4, OUT4)
    assert jnp.allclose(out4, ref4, atol=5e-3, rtol=5e-3)

    print("KERNEL_OK")
</pallas_src>

<mosaic_0001>
module attributes {stable_mosaic.version = 11 : i64} {
  func.func @_affine_linear_kernel(%arg0: i32, %arg1: i32, %arg2: memref<16x32xf32, #tpu.memory_space<vmem>>, %arg3: memref<32x32xf32, #tpu.memory_space<vmem>>, %arg4: memref<1x32xf32, #tpu.memory_space<vmem>>, %arg5: memref<16x32xf32, #tpu.memory_space<vmem>>) attributes {dimension_semantics = [#tpu.dimension_semantics<parallel>, #tpu.dimension_semantics<parallel>], iteration_bounds = array<i64: 1, 1>, scalar_prefetch = 0 : i64, scratch_operands = 0 : i64, tpu.core_type = #tpu.core_type<tc>, window_params = [{transform_indices = @transform_0, window_bounds = array<i64: 16, 32>}, {transform_indices = @transform_1, window_bounds = array<i64: 32, 32>}, {transform_indices = @transform_2, window_bounds = array<i64: 1, 32>}, {transform_indices = @transform_3, window_bounds = array<i64: 16, 32>}]} {
    %c0 = arith.constant 0 : index
    %c0_0 = arith.constant 0 : index
    %0 = vector.load %arg2[%c0, %c0_0] : memref<16x32xf32, #tpu.memory_space<vmem>>, vector<16x32xf32>
    %c0_1 = arith.constant 0 : index
    %c0_2 = arith.constant 0 : index
    %1 = vector.load %arg3[%c0_1, %c0_2] : memref<32x32xf32, #tpu.memory_space<vmem>>, vector<32x32xf32>
    %cst = arith.constant dense<0.000000e+00> : vector<16x32xf32>
    %2 = tpu.matmul %0, %1, %cst {dimension_numbers = #tpu.dot_dimension_numbers<[1], [0], [0], [1], [0, 0, 1, 1], [], []>} : vector<16x32xf32>, vector<32x32xf32>, vector<16x32xf32> -> vector<16x32xf32>
    %c0_3 = arith.constant 0 : index
    %c0_4 = arith.constant 0 : index
    %3 = vector.load %arg4[%c0_3, %c0_4] : memref<1x32xf32, #tpu.memory_space<vmem>>, vector<1x32xf32>
    %4 = vector.broadcast %3 : vector<1x32xf32> to vector<16x32xf32>
    %5 = arith.addf %2, %4 : vector<16x32xf32>
    %c0_5 = arith.constant 0 : index
    %c0_6 = arith.constant 0 : index
    %6 = vector.load %arg5[%c0_5, %c0_6] : memref<16x32xf32, #tpu.memory_space<vmem>>, vector<16x32xf32>
    tpu.vector_store %arg5[%c0_5, %c0_6], %5 {strides = array<i32>} : memref<16x32xf32, #tpu.memory_space<vmem>>, vector<16x32xf32>,
    return
  }
  func.func @transform_0(%arg0: i32, %arg1: i32) -> (i32, i32) {
    %c0_i32 = arith.constant 0 : i32
    %c0_i32_0 = arith.constant 0 : i32
    return %arg0, %c0_i32 : i32, i32
  }
  func.func @transform_1(%arg0: i32, %arg1: i32) -> (i32, i32) {
    %c0_i32 = arith.constant 0 : i32
    %c0_i32_0 = arith.constant 0 : i32
    return %c0_i32, %arg1 : i32, i32
  }
  func.func @transform_2(%arg0: i32, %arg1: i32) -> (i32, i32) {
    %c0_i32 = arith.constant 0 : i32
    %c0_i32_0 = arith.constant 0 : i32
    return %c0_i32, %arg1 : i32, i32
  }
  func.func @transform_3(%arg0: i32, %arg1: i32) -> (i32, i32) {
    %c0_i32 = arith.constant 0 : i32
    return %arg0, %arg1 : i32, i32
  }
}

</mosaic_0001>

<bundles_post_ra>
// kernel: tpu_custom_call.1
= control target key start
LH: loop header
LB: loop body
LE: loop exit
PB: predicated region body
PF: predicated region fallthrough
CT: control target
= control target key end

     0   :  { %8 = vsyncpa [#allocation3], 0  ;;  %s249_s0 = inlined_call_operand.hbm [shape: f32[16,32], index: 0, kind: input, shape index: {}]   ;;  %s250_s1 = inlined_call_operand.hbm [shape: f32[32,32], index: 1, kind: input, shape index: {}]   ;;  %s251_s2 = inlined_call_operand.vmem [shape: f32[1,32], index: 2, kind: input, shape index: {}]   ;;  %s252_s3 = inlined_call_operand.hbm [shape: f32[16,32], index: 3, kind: output, shape index: {}]  }
   0x1   :  { %9 = vsyncpa [#allocation6], 0 }
   0x2   :  { %10 = vsyncpa [#allocation4], 0  ;;  %s15_s14 = sshll.u32 %s249_s0, 4  ;;  %s199_s15 = smov [#allocation2]   ;;  %s16_s14 = int_to_ptr.hbm [resolvable:$true] %s15_s14 }
   0x3   :  { %s17_s16 = sshll.u32 %s199_s15, 4  ;;  %s28_s19 = sshll.u32 %s250_s1, 4  ;;  %s18_s16 = int_to_ptr.vmem [resolvable:$true] %s17_s16  ;;  %s29_s19 = int_to_ptr.hbm [resolvable:$true] %s28_s19 }
   0x4   :  { %s200_s20 = smov 128   ;;  %s201_s21 = smov 8  }
   0x5   :  { %23 = dma.hbm_to_vmem [thread:$0]  %s16_s14, 256, %s18_s16, [#allocation3], %s200_s20, %s200_s20, %s201_s21  }
   0x6   :  { %s202_s22 = smov [#allocation5]  }
   0x7   :  { %s30_s23 = sshll.u32 %s202_s22, 4  ;;  %s31_s23 = int_to_ptr.vmem [resolvable:$true] %s30_s23 }
   0x8   :  { %36 = dma.hbm_to_vmem [thread:$0]  %s29_s19, 512, %s31_s23, [#allocation6], %s200_s20, %s200_s20, %s201_s21  }
   0x9   :  { %193 = dma.done.wait [#allocation3], 256  }
   0xa   :  { %194 = vsyncadd [#allocation3], 4294967040 }
   0xb   :  { %195 = dma.done.wait [#allocation6], 512  }
   0xc   :  { %196 = vsyncadd [#allocation6], 4294966784  ;;  %v52_v0 = vld [vmem:[#allocation5 + $0x18] sm:$0xff]  ;;  %v51_v1 = vld [vmem:[#allocation5 + $0x10] sm:$0xff]  ;;  %vm57_vm0 = vcmask 261120   ;;  %s203_s24 = smov [#allocation7]  }
   0xd   :  { %76 = vmatpush.msra.mxu0 %v52_v0  ;;  %111 = vmatpush.msra.mxu1 %v52_v0  ;;  %v50_v2 = vld [vmem:[#allocation5 + $0x8] sm:$0xff]  ;;  %v49_v3 = vld [vmem:[#allocation5] sm:$0xff]  ;;  %v47_v4 = vld [vmem:[#allocation2] sm:$0xff]  ;;  %s93_s25 = sshll.u32 %s203_s24, 4  ;;  %s95_s28 = sshll.u32 %s252_s3, 4  ;;  %s94_s25 = int_to_ptr.vmem [resolvable:$true] %s93_s25  ;;  %s96_s28 = int_to_ptr.hbm [resolvable:$true] %s95_s28 }
   0xe   :  { %v48_v5 = vld [vmem:[#allocation2 + $0x8] sm:$0xff]  ;;  %v120_v6 = vld [vmem:[%s251_s2] ss:$0 sm:$0xff] }
   0xf   :  { %77 = vmatpush.msra.mxu0 %v51_v1  ;;  %112 = vmatpush.msra.mxu1 %v51_v1 }
  0x11   :  { %78 = vmatpush.msra.mxu0 %v50_v2  ;;  %113 = vmatpush.msra.mxu1 %v50_v2 }
  0x13   :  { %79 = vmatpush.msra.mxu0 %v49_v3  ;;  %114 = vmatpush.msra.mxu1 %v49_v3 }
  0x14   :  { %109 = vmatmul.msk.f32.vlgmr.msra.gmra.mxu0 %vm57_vm0, %v47_v4  ;;  %110 = vmatmul.msk.f32.vlgmr.msra.gmra.mxu1 %vm57_vm0, %v48_v5 }
  0x91   :  { %v81_v7 = vpop.f32.mrf.mxu0  ;;  %v84_v8 = vpop.f32.mrf.mxu1 }
  0x92   :  { %v82_v9 = vadd.f32 %v120_v6, %v81_v7  ;;  %v85_v10 = vadd.f32 %v120_v6, %v84_v8 }
  0x94   :  { %87 = vst.msk [vmem:[#allocation7] sm:$0xff] %vm57_vm0, %v82_v9 }
  0x95   :  { %88 = vst.msk [vmem:[#allocation7 + $0x8] sm:$0xff] %vm57_vm0, %v85_v10 }
  0x96   :  { %101 = dma.vmem_to_hbm [thread:$0]  %s94_s25, 256, %s96_s28, [#allocation4], %s200_s20, %s200_s20, %s201_s21  }
  0x97   :  { %197 = dma.done.wait [#allocation4], 256  }
  0x98   :  { %198 = vsyncadd [#allocation4], 4294967040 }
  0x99   :  { %106 = vsyncpa [#allocation3], 1 }
  0x9a   :  { %107 = vsyncpa [#allocation6], 1 }
  0x9b   :  { %108 = vsyncpa [#allocation4], 1 }

</bundles_post_ra>
